<compile_context>
chip_gen: v7x
topology: tpu7x:2x2x1
jax: 0.10.0
libtpu: 0.0.40
codegen_flags: <defaults>
</compile_context>

<pallas_src>
import jax
import jax.numpy as jnp
from jax.experimental import pallas as pl
from jax.experimental.pallas import tpu as pltpu


def _adaptive_att_kernel(
    V_ref, h_ref, s_ref,
    Was_ref, bas_ref,      # affine_s
    Wah_ref, bah_ref,      # affine_h
    Ws_ref, bs_ref,        # w_s
    Wg_ref, bg_ref,        # w_g
    Wv_ref, bv_ref,        # w_v
    wh_ref,                # w_h weight row (1, A); b_h dropped (softmax-invariant)
    Wp_ref, bp_ref,        # W_p
    out_ref, alpha_ref,
):
    f32 = jnp.float32
    Bt, P, D = V_ref.shape
    A = Wg_ref.shape[1]
    cdt = V_ref.dtype               # MXU input dtype (f32 or bf16); accumulation is f32

    V = V_ref[...]                  # (Bt, P, D)

    # s_t = relu(affine_s(s_t)) ; h_t = tanh(affine_h(h_t))   (activations in f32)
    s = jax.nn.relu(
        jnp.dot(s_ref[...], Was_ref[...], preferred_element_type=f32) + bas_ref[...])
    h = jnp.tanh(
        jnp.dot(h_ref[...], Wah_ref[...], preferred_element_type=f32) + bah_ref[...])

    # Attention projections (MXU, f32 accumulation).
    hidden_att = jnp.dot(h.astype(cdt), Wg_ref[...],
                         preferred_element_type=f32) + bg_ref[...]              # (Bt, A)
    sentinel_att = jnp.dot(s.astype(cdt), Ws_ref[...],
                           preferred_element_type=f32) + bs_ref[...]            # (Bt, A)
    # One tall (Bt*P, D) @ (D, A) matmul instead of Bt tiny batched matmuls.
    visual_att = (jnp.dot(V.reshape(Bt * P, D), Wv_ref[...],
                          preferred_element_type=f32)
                  + bv_ref[...]).reshape(Bt, P, A)                               # (Bt, P, A)

    # extended = tanh(att + hidden_att); sentinel row kept separate (no concat).
    ext_vis = jnp.tanh(visual_att + hidden_att[:, None, :])                      # (Bt, P, A)
    ext_sent = jnp.tanh(sentinel_att + hidden_att)                               # (Bt, A)

    # z = w_h(extended): elementwise mul + lane reduce in f32. The w_h bias is a
    # constant added to every logit -> no effect on softmax -> omitted.
    wh = wh_ref[...]                                                             # (1, A) f32
    z_vis = jnp.sum(ext_vis * wh[None, :, :], axis=-1)                           # (Bt, P)
    z_sent = jnp.sum(ext_sent * wh, axis=-1, keepdims=True)                      # (Bt, 1)

    # Fused softmax over pixels + sentinel — never materializes a (Bt, P+1) tensor.
    m = jnp.maximum(jnp.max(z_vis, axis=-1, keepdims=True), z_sent)              # (Bt, 1)
    e_vis = jnp.exp(z_vis - m)
    e_sent = jnp.exp(z_sent - m)
    denom = jnp.sum(e_vis, axis=-1, keepdims=True) + e_sent
    # (exact divide kept for tight numerical match; pl.reciprocal(approx=True) is the
    #  EUP-slot alternative at ~1e-3 rel err)
    alpha_vis = e_vis / denom                                                    # (Bt, P)
    beta = e_sent / denom                                                        # (Bt, 1)

    # c_hat = sum_p alpha_p * V_p + beta * s   (no duplicated [V ; s] in VMEM).
    c_hat = jnp.sum(V.astype(f32) * alpha_vis[:, :, None], axis=1) + beta * s    # (Bt, D)

    # adaptive_out = tanh(W_p(c_hat + h))
    adaptive_out = jnp.tanh(
        jnp.dot((c_hat + h).astype(cdt), Wp_ref[...],
                preferred_element_type=f32) + bp_ref[...])                       # (Bt, D)

    out_ref[...] = adaptive_out.astype(out_ref.dtype)
    alpha_ref[...] = alpha_vis.astype(alpha_ref.dtype)
    # beta is NOT stored: alpha + beta sums to 1, wrapper recovers it (avoids a
    # 1-lane masked store + strided writeback DMA per grid step).


# ----------------------------- wrapper / tiling ------------------------------

def _round_up(x, m):
    return ((x + m - 1) // m) * m


def _vmem_capacity_bytes():
    """Per-TensorCore VMEM capacity; conservative 64 MiB (v7x) fallback."""
    try:
        return int(pltpu.get_tpu_info().vmem_capacity_bytes)
    except Exception:
        return 64 << 20


def _per_row_bytes(P, D, A, cbytes):
    """Per-batch-row VMEM working set for one grid step."""
    return (2 * P * D * cbytes       # V tile (double-buffered by the auto pipeline)
            + 3 * P * A * 4          # visual_att / tanh'd extended / mul-reduce temp (f32)
            + P * D * 4              # alpha-weighted V product (f32)
            + 2 * (D + P) * 4        # double-buffered outputs
            + 16 * (D + A) * 4)      # small (Bt, D)/(Bt, A) vectors


def _weight_vmem_bytes(D, A, cbytes):
    """Resident weight footprint, counting the pipeline's 2x buffering + (8,128) bias padding."""
    mats = (3 * D * D + 3 * D * A) * cbytes
    pad = max(_round_up(D, 128), _round_up(A, 128))
    biases = 7 * 8 * pad * 4         # seven (1, X) f32 rows each pad to (8, round_up(X,128))
    return 2 * (mats + biases)


def _choose_b_tile(B, P, D, A, cbytes, budget_bytes):
    """Largest sublane-aligned batch tile within budget, with >=2 grid steps when possible."""
    per_row = max(_per_row_bytes(P, D, A, cbytes), 1)
    bt = max(1, budget_bytes // per_row)
    pack = 16 if cbytes == 2 else 8          # bf16 packs 16 rows per vreg, f32 packs 8
    if B >= 2 * pack:
        # v7x megacore: keep at least 2 grid steps so "parallel" can shard across both TCs.
        bt = min(bt, max(pack, ((B + 1) // 2 // pack) * pack))
    if bt >= B:
        return int(B)                        # block == full dim (only when B < 2*pack)
    if bt >= pack:
        return int(bt // pack) * pack
    return int(pack if B > pack else B)


def adaptive_attention_forward(V, h_t, s_t, params, *,
                               compute_dtype=jnp.bfloat16, b_tile=None):
    """Returns (adaptive_out (B, D), alpha_hat_t (B, P), beta_t (B, 1))."""
    B, P, D = V.shape
    A = params['W_g'].shape[1]
    f32 = jnp.float32
    cdt = jnp.dtype(compute_dtype)
    cbytes = cdt.itemsize

    capacity = _vmem_capacity_bytes()
    w_bytes = _weight_vmem_bytes(D, A, cbytes)
    per_row = _per_row_bytes(P, D, A, cbytes)

    if b_tile is None:
        # ~55% of physical VMEM for the per-step tile working set (=> ~70 MiB on
        # 128 MiB v5e/v6e, ~35 MiB on 64 MiB v7x), minus the resident weights.
        budget = max(8 << 20, int(capacity * 0.55) - w_bytes)
        b_tile = _choose_b_tile(B, P, D, A, cbytes, budget)
    b_tile = int(min(b_tile, B))
    # Tail grid step (when B % b_tile != 0) reads a padded partial block of V/h/s;
    # rows are independent, so padded-row garbage never leaks into real outputs.
    grid = (pl.cdiv(B, b_tile),)

    inputs = (
        V.astype(cdt), h_t.astype(cdt), s_t.astype(cdt),
        params['W_affine_s'].astype(cdt), params['b_affine_s'].astype(f32).reshape(1, D),
        params['W_affine_h'].astype(cdt), params['b_affine_h'].astype(f32).reshape(1, D),
        params['W_s'].astype(cdt), params['b_s'].astype(f32).reshape(1, A),
        params['W_g'].astype(cdt), params['b_g'].astype(f32).reshape(1, A),
        params['W_v'].astype(cdt), params['b_v'].astype(f32).reshape(1, A),
        params['w_h'].astype(f32).reshape(1, A),
        params['W_p'].astype(cdt), params['b_p'].astype(f32).reshape(1, D),
    )
    # NOTE: params['b_h'] is intentionally not passed — adding the same scalar to every
    # softmax logit leaves alpha/beta (and hence the output) unchanged.

    def _resident(shape):
        nd = len(shape)
        return pl.BlockSpec(shape, lambda i, _nd=nd: (0,) * _nd)

    in_specs = [
        pl.BlockSpec((b_tile, P, D), lambda i: (i, 0, 0)),     # V        (batch-tiled)
        pl.BlockSpec((b_tile, D), lambda i: (i, 0)),           # h_t      (batch-tiled)
        pl.BlockSpec((b_tile, D), lambda i: (i, 0)),           # s_t      (batch-tiled)
        _resident((D, D)), _resident((1, D)),                  # affine_s (resident)
        _resident((D, D)), _resident((1, D)),                  # affine_h
        _resident((D, A)), _resident((1, A)),                  # w_s
        _resident((D, A)), _resident((1, A)),                  # w_g
        _resident((D, A)), _resident((1, A)),                  # w_v
        _resident((1, A)),                                     # w_h weight row
        _resident((D, D)), _resident((1, D)),                  # W_p
    ]

    out_shapes = (
        jax.ShapeDtypeStruct((B, D), f32),     # adaptive_out
        jax.ShapeDtypeStruct((B, P), f32),     # alpha_hat_t (spatial attention)
    )
    out_specs = (
        pl.BlockSpec((b_tile, D), lambda i: (i, 0)),
        pl.BlockSpec((b_tile, P), lambda i: (i, 0)),
    )

    # Generation-aware VMEM limit: never above ~80% of physical (=> ~51 MiB on v7x's
    # 64 MiB/TC, ~102 MiB on 128 MiB v5e/v6e); count 2x-buffered weights + tile + slack.
    vmem_cap = int(capacity * 0.8)
    vmem_limit = int(min(max(32 << 20, w_bytes + b_tile * per_row + (8 << 20)), vmem_cap))

    # Advisory cost estimate for the surrounding XLA schedule.
    flops = 2 * B * (P * D * A + 2 * D * A + 3 * D * D + (P + 1) * A + 2 * P * D)
    transcendentals = B * ((P + 1) * A + 3 * D + (P + 1))
    bytes_accessed = (B * P * D * cbytes + 2 * B * D * cbytes
                      + (3 * D * D + 3 * D * A) * cbytes + (3 * D + 4 * A) * 4
                      + B * (D + P) * 4)

    fn = pl.pallas_call(
        _adaptive_att_kernel,
        out_shape=out_shapes,
        grid=grid,
        in_specs=in_specs,
        out_specs=out_specs,
        compiler_params=pltpu.CompilerParams(
            dimension_semantics=("parallel",),        # megacore-shardable batch axis
            vmem_limit_bytes=vmem_limit),
        cost_estimate=pl.CostEstimate(
            flops=flops, transcendentals=transcendentals,
            bytes_accessed=bytes_accessed),
    )
    adaptive_out, alpha_hat_t = fn(*inputs)
    # Sentinel gate: softmax rows (alpha, beta) sum to 1, so recover beta outside
    # the kernel instead of storing a lane-sparse (B, 1) output per grid step.
    beta_t = 1.0 - jnp.sum(alpha_hat_t, axis=-1, keepdims=True)
    return adaptive_out, alpha_hat_t, beta_t


# --------------------------------- reference ---------------------------------

def _reference(V, h_t, s_t, p):
    """Pure-JAX reference mirroring the PyTorch forward."""
    s = jax.nn.relu(s_t @ p['W_affine_s'] + p['b_affine_s'])
    h = jnp.tanh(h_t @ p['W_affine_h'] + p['b_affine_h'])
    hidden_att = (h @ p['W_g'] + p['b_g'])[:, None, :]
    visual_att = jnp.einsum('bpd,da->bpa', V, p['W_v']) + p['b_v']
    sentinel_att = s @ p['W_s'] + p['b_s']
    extended = jnp.concatenate([visual_att, sentinel_att[:, None, :]], axis=1)
    extended = jnp.tanh(extended + hidden_att)
    z = jnp.sum(extended * p['w_h'][None, None, :], axis=-1) + p['b_h'][0]
    alpha = jax.nn.softmax(z, axis=1)
    concat_feature = jnp.concatenate([V, s[:, None, :]], axis=1)
    c_hat = jnp.sum(concat_feature * alpha[:, :, None], axis=1)
    out = jnp.tanh((c_hat + h) @ p['W_p'] + p['b_p'])
    return out, alpha[:, :-1], alpha[:, -1:]


if __name__ == "__main__":
    B, P, D, A = 2, 8, 32, 32   # batch, num_pixels, decoder_dim, attention_dim

    key = jax.random.PRNGKey(0)
    k_v, k_h, k_s, k_w = jax.random.split(key, 4)

    V = jax.random.normal(k_v, (B, P, D), dtype=jnp.float32)
    h_t = jax.random.normal(k_h, (B, D), dtype=jnp.float32)
    s_t = jax.random.normal(k_s, (B, D), dtype=jnp.float32)

    # Deterministic parameter init (weights stored as (in, out), i.e. W.T of PyTorch).
    wkeys = jax.random.split(k_w, 14)
    scale = 0.1
    params = {
        'W_affine_s': scale * jax.random.normal(wkeys[0], (D, D), jnp.float32),
        'b_affine_s': scale * jax.random.normal(wkeys[1], (D,), jnp.float32),
        'W_affine_h': scale * jax.random.normal(wkeys[2], (D, D), jnp.float32),
        'b_affine_h': scale * jax.random.normal(wkeys[3], (D,), jnp.float32),
        'W_s': scale * jax.random.normal(wkeys[4], (D, A), jnp.float32),
        'b_s': scale * jax.random.normal(wkeys[5], (A,), jnp.float32),
        'W_g': scale * jax.random.normal(wkeys[6], (D, A), jnp.float32),
        'b_g': scale * jax.random.normal(wkeys[7], (A,), jnp.float32),
        'W_v': scale * jax.random.normal(wkeys[8], (D, A), jnp.float32),
        'b_v': scale * jax.random.normal(wkeys[9], (A,), jnp.float32),
        'w_h': scale * jax.random.normal(wkeys[10], (A,), jnp.float32),
        'b_h': scale * jax.random.normal(wkeys[11], (1,), jnp.float32),
        'W_p': scale * jax.random.normal(wkeys[12], (D, D), jnp.float32),
        'b_p': scale * jax.random.normal(wkeys[13], (D,), jnp.float32),
    }

    ref_out, ref_alpha, ref_beta = _reference(V, h_t, s_t, params)

    # f32 MXU-input path: tight match against the pure-JAX reference.
    out, alpha_hat, beta = adaptive_attention_forward(
        V, h_t, s_t, params, compute_dtype=jnp.float32)
    jax.block_until_ready((out, alpha_hat, beta))
    assert out.shape == (B, D) and alpha_hat.shape == (B, P) and beta.shape == (B, 1)
    assert jnp.allclose(out, ref_out, atol=1e-5, rtol=1e-5)
    assert jnp.allclose(alpha_hat, ref_alpha, atol=1e-5, rtol=1e-5)
    assert jnp.allclose(beta, ref_beta, atol=1e-5, rtol=1e-5)

    # Default (bf16 MXU-input) path: halves HBM/VMEM traffic for V and the weights;
    # post-matmul math stays f32, so only input rounding error remains -> looser tolerance.
    out_bf, alpha_bf, beta_bf = adaptive_attention_forward(V, h_t, s_t, params)
    jax.block_until_ready((out_bf, alpha_bf, beta_bf))
    assert jnp.allclose(out_bf, ref_out, atol=3e-2, rtol=3e-2)
    assert jnp.allclose(alpha_bf, ref_alpha, atol=3e-2, rtol=3e-2)
    assert jnp.allclose(beta_bf, ref_beta, atol=3e-2, rtol=3e-2)

    print("KERNEL_OK")
</pallas_src>

<mosaic_0001>
module attributes {stable_mosaic.version = 11 : i64} {
  func.func @_adaptive_att_kernel(%arg0: i32, %arg1: memref<2x8x32xf32, #tpu.memory_space<vmem>>, %arg2: memref<2x32xf32, #tpu.memory_space<vmem>>, %arg3: memref<2x32xf32, #tpu.memory_space<vmem>>, %arg4: memref<32x32xf32, #tpu.memory_space<vmem>>, %arg5: memref<1x32xf32, #tpu.memory_space<vmem>>, %arg6: memref<32x32xf32, #tpu.memory_space<vmem>>, %arg7: memref<1x32xf32, #tpu.memory_space<vmem>>, %arg8: memref<32x32xf32, #tpu.memory_space<vmem>>, %arg9: memref<1x32xf32, #tpu.memory_space<vmem>>, %arg10: memref<32x32xf32, #tpu.memory_space<vmem>>, %arg11: memref<1x32xf32, #tpu.memory_space<vmem>>, %arg12: memref<32x32xf32, #tpu.memory_space<vmem>>, %arg13: memref<1x32xf32, #tpu.memory_space<vmem>>, %arg14: memref<1x32xf32, #tpu.memory_space<vmem>>, %arg15: memref<32x32xf32, #tpu.memory_space<vmem>>, %arg16: memref<1x32xf32, #tpu.memory_space<vmem>>, %arg17: memref<2x32xf32, #tpu.memory_space<vmem>>, %arg18: memref<2x8xf32, #tpu.memory_space<vmem>>) attributes {dimension_semantics = [#tpu.dimension_semantics<parallel>], iteration_bounds = array<i64: 1>, scalar_prefetch = 0 : i64, scratch_operands = 0 : i64, tpu.core_type = #tpu.core_type<tc>, window_params = [{transform_indices = @transform_0, window_bounds = array<i64: 2, 8, 32>}, {transform_indices = @transform_1, window_bounds = array<i64: 2, 32>}, {transform_indices = @transform_2, window_bounds = array<i64: 2, 32>}, {pipeline_mode = #tpu.pipeline_mode<synchronous>, transform_indices = @transform_3, window_bounds = array<i64: 32, 32>}, {pipeline_mode = #tpu.pipeline_mode<synchronous>, transform_indices = @transform_4, window_bounds = array<i64: 1, 32>}, {pipeline_mode = #tpu.pipeline_mode<synchronous>, transform_indices = @transform_5, window_bounds = array<i64: 32, 32>}, {pipeline_mode = #tpu.pipeline_mode<synchronous>, transform_indices = @transform_6, window_bounds = array<i64: 1, 32>}, {pipeline_mode = #tpu.pipeline_mode<synchronous>, transform_indices = @transform_7, window_bounds = array<i64: 32, 32>}, {pipeline_mode = #tpu.pipeline_mode<synchronous>, transform_indices = @transform_8, window_bounds = array<i64: 1, 32>}, {pipeline_mode = #tpu.pipeline_mode<synchronous>, transform_indices = @transform_9, window_bounds = array<i64: 32, 32>}, {pipeline_mode = #tpu.pipeline_mode<synchronous>, transform_indices = @transform_10, window_bounds = array<i64: 1, 32>}, {pipeline_mode = #tpu.pipeline_mode<synchronous>, transform_indices = @transform_11, window_bounds = array<i64: 32, 32>}, {pipeline_mode = #tpu.pipeline_mode<synchronous>, transform_indices = @transform_12, window_bounds = array<i64: 1, 32>}, {pipeline_mode = #tpu.pipeline_mode<synchronous>, transform_indices = @transform_13, window_bounds = array<i64: 1, 32>}, {pipeline_mode = #tpu.pipeline_mode<synchronous>, transform_indices = @transform_14, window_bounds = array<i64: 32, 32>}, {pipeline_mode = #tpu.pipeline_mode<synchronous>, transform_indices = @transform_15, window_bounds = array<i64: 1, 32>}, {transform_indices = @transform_16, window_bounds = array<i64: 2, 32>}, {transform_indices = @transform_17, window_bounds = array<i64: 2, 8>}]} {
    %c0 = arith.constant 0 : index
    %c0_0 = arith.constant 0 : index
    %c0_1 = arith.constant 0 : index
    %0 = vector.load %arg1[%c0, %c0_0, %c0_1] : memref<2x8x32xf32, #tpu.memory_space<vmem>>, vector<2x8x32xf32>
    %c0_2 = arith.constant 0 : index
    %c0_3 = arith.constant 0 : index
    %1 = vector.load %arg3[%c0_2, %c0_3] : memref<2x32xf32, #tpu.memory_space<vmem>>, vector<2x32xf32>
    %c0_4 = arith.constant 0 : index
    %c0_5 = arith.constant 0 : index
    %2 = vector.load %arg4[%c0_4, %c0_5] : memref<32x32xf32, #tpu.memory_space<vmem>>, vector<32x32xf32>
    %cst = arith.constant dense<0.000000e+00> : vector<2x32xf32>
    %3 = tpu.matmul %1, %2, %cst {dimension_numbers = #tpu.dot_dimension_numbers<[1], [0], [0], [1], [0, 0, 1, 1], [], []>} : vector<2x32xf32>, vector<32x32xf32>, vector<2x32xf32> -> vector<2x32xf32>
    %c0_6 = arith.constant 0 : index
    %c0_7 = arith.constant 0 : index
    %4 = vector.load %arg5[%c0_6, %c0_7] : memref<1x32xf32, #tpu.memory_space<vmem>>, vector<1x32xf32>
    %5 = vector.broadcast %4 : vector<1x32xf32> to vector<2x32xf32>
    %6 = arith.addf %3, %5 : vector<2x32xf32>
    %cst_8 = arith.constant 0.000000e+00 : f32
    %7 = vector.broadcast %cst_8 : f32 to vector<2x32xf32>
    %8 = arith.maximumf %6, %7 : vector<2x32xf32>
    %c0_9 = arith.constant 0 : index
    %c0_10 = arith.constant 0 : index
    %9 = vector.load %arg2[%c0_9, %c0_10] : memref<2x32xf32, #tpu.memory_space<vmem>>, vector<2x32xf32>
    %c0_11 = arith.constant 0 : index
    %c0_12 = arith.constant 0 : index
    %10 = vector.load %arg6[%c0_11, %c0_12] : memref<32x32xf32, #tpu.memory_space<vmem>>, vector<32x32xf32>
    %cst_13 = arith.constant dense<0.000000e+00> : vector<2x32xf32>
    %11 = tpu.matmul %9, %10, %cst_13 {dimension_numbers = #tpu.dot_dimension_numbers<[1], [0], [0], [1], [0, 0, 1, 1], [], []>} : vector<2x32xf32>, vector<32x32xf32>, vector<2x32xf32> -> vector<2x32xf32>
    %c0_14 = arith.constant 0 : index
    %c0_15 = arith.constant 0 : index
    %12 = vector.load %arg7[%c0_14, %c0_15] : memref<1x32xf32, #tpu.memory_space<vmem>>, vector<1x32xf32>
    %13 = vector.broadcast %12 : vector<1x32xf32> to vector<2x32xf32>
    %14 = arith.addf %11, %13 : vector<2x32xf32>
    %15 = math.tanh %14 : vector<2x32xf32>
    %c0_16 = arith.constant 0 : index
    %c0_17 = arith.constant 0 : index
    %16 = vector.load %arg10[%c0_16, %c0_17] : memref<32x32xf32, #tpu.memory_space<vmem>>, vector<32x32xf32>
    %cst_18 = arith.constant dense<0.000000e+00> : vector<2x32xf32>
    %17 = tpu.matmul %15, %16, %cst_18 {dimension_numbers = #tpu.dot_dimension_numbers<[1], [0], [0], [1], [0, 0, 1, 1], [], []>} : vector<2x32xf32>, vector<32x32xf32>, vector<2x32xf32> -> vector<2x32xf32>
    %c0_19 = arith.constant 0 : index
    %c0_20 = arith.constant 0 : index
    %18 = vector.load %arg11[%c0_19, %c0_20] : memref<1x32xf32, #tpu.memory_space<vmem>>, vector<1x32xf32>
    %19 = vector.broadcast %18 : vector<1x32xf32> to vector<2x32xf32>
    %20 = arith.addf %17, %19 : vector<2x32xf32>
    %c0_21 = arith.constant 0 : index
    %c0_22 = arith.constant 0 : index
    %21 = vector.load %arg8[%c0_21, %c0_22] : memref<32x32xf32, #tpu.memory_space<vmem>>, vector<32x32xf32>
    %cst_23 = arith.constant dense<0.000000e+00> : vector<2x32xf32>
    %22 = tpu.matmul %8, %21, %cst_23 {dimension_numbers = #tpu.dot_dimension_numbers<[1], [0], [0], [1], [0, 0, 1, 1], [], []>} : vector<2x32xf32>, vector<32x32xf32>, vector<2x32xf32> -> vector<2x32xf32>
    %c0_24 = arith.constant 0 : index
    %c0_25 = arith.constant 0 : index
    %23 = vector.load %arg9[%c0_24, %c0_25] : memref<1x32xf32, #tpu.memory_space<vmem>>, vector<1x32xf32>
    %24 = vector.broadcast %23 : vector<1x32xf32> to vector<2x32xf32>
    %25 = arith.addf %22, %24 : vector<2x32xf32>
    %26 = vector.shape_cast %0 : vector<2x8x32xf32> to vector<16x32xf32>
    %c0_26 = arith.constant 0 : index
    %c0_27 = arith.constant 0 : index
    %27 = vector.load %arg12[%c0_26, %c0_27] : memref<32x32xf32, #tpu.memory_space<vmem>>, vector<32x32xf32>
    %cst_28 = arith.constant dense<0.000000e+00> : vector<16x32xf32>
    %28 = tpu.matmul %26, %27, %cst_28 {dimension_numbers = #tpu.dot_dimension_numbers<[1], [0], [0], [1], [0, 0, 1, 1], [], []>} : vector<16x32xf32>, vector<32x32xf32>, vector<16x32xf32> -> vector<16x32xf32>
    %c0_29 = arith.constant 0 : index
    %c0_30 = arith.constant 0 : index
    %29 = vector.load %arg13[%c0_29, %c0_30] : memref<1x32xf32, #tpu.memory_space<vmem>>, vector<1x32xf32>
    %30 = vector.broadcast %29 : vector<1x32xf32> to vector<16x32xf32>
    %31 = arith.addf %28, %30 : vector<16x32xf32>
    %32 = vector.shape_cast %31 : vector<16x32xf32> to vector<2x8x32xf32>
    %33 = vector.shape_cast %20 : vector<2x32xf32> to vector<2x1x32xf32>
    %34 = vector.broadcast %33 : vector<2x1x32xf32> to vector<2x8x32xf32>
    %35 = arith.addf %32, %34 : vector<2x8x32xf32>
    %36 = math.tanh %35 : vector<2x8x32xf32>
    %37 = arith.addf %25, %20 : vector<2x32xf32>
    %38 = math.tanh %37 : vector<2x32xf32>
    %c0_31 = arith.constant 0 : index
    %c0_32 = arith.constant 0 : index
    %39 = vector.load %arg14[%c0_31, %c0_32] : memref<1x32xf32, #tpu.memory_space<vmem>>, vector<1x32xf32>
    %40 = vector.shape_cast %39 : vector<1x32xf32> to vector<1x1x32xf32>
    %41 = vector.broadcast %40 : vector<1x1x32xf32> to vector<2x8x32xf32>
    %42 = arith.mulf %36, %41 : vector<2x8x32xf32>
    %cst_33 = arith.constant dense<0.000000e+00> : vector<2x8xf32>
    %43 = vector.multi_reduction <add>, %42, %cst_33 [2] : vector<2x8x32xf32> to vector<2x8xf32>
    %44 = vector.broadcast %39 : vector<1x32xf32> to vector<2x32xf32>
    %45 = arith.mulf %38, %44 : vector<2x32xf32>
    %cst_34 = arith.constant dense<0.000000e+00> : vector<2xf32>
    %46 = vector.multi_reduction <add>, %45, %cst_34 [1] : vector<2x32xf32> to vector<2xf32>
    %47 = vector.shape_cast %46 : vector<2xf32> to vector<2x1xf32>
    %cst_35 = arith.constant dense<0xFF800000> : vector<2xf32>
    %48 = vector.multi_reduction <maximumf>, %43, %cst_35 [1] : vector<2x8xf32> to vector<2xf32>
    %49 = vector.shape_cast %48 : vector<2xf32> to vector<2x1xf32>
    %50 = arith.maximumf %49, %47 : vector<2x1xf32>
    %51 = vector.broadcast %50 : vector<2x1xf32> to vector<2x8xf32>
    %52 = arith.subf %43, %51 : vector<2x8xf32>
    %53 = math.exp %52 : vector<2x8xf32>
    %54 = arith.subf %47, %50 : vector<2x1xf32>
    %55 = math.exp %54 : vector<2x1xf32>
    %cst_36 = arith.constant dense<0.000000e+00> : vector<2xf32>
    %56 = vector.multi_reduction <add>, %53, %cst_36 [1] : vector<2x8xf32> to vector<2xf32>
    %57 = vector.shape_cast %56 : vector<2xf32> to vector<2x1xf32>
    %58 = arith.addf %57, %55 : vector<2x1xf32>
    %59 = vector.broadcast %58 : vector<2x1xf32> to vector<2x8xf32>
    %60 = arith.divf %53, %59 : vector<2x8xf32>
    %61 = arith.divf %55, %58 : vector<2x1xf32>
    %62 = vector.shape_cast %60 : vector<2x8xf32> to vector<2x8x1xf32>
    %63 = vector.broadcast %62 : vector<2x8x1xf32> to vector<2x8x32xf32>
    %64 = arith.mulf %0, %63 : vector<2x8x32xf32>
    %cst_37 = arith.constant dense<0.000000e+00> : vector<2x32xf32>
    %65 = vector.multi_reduction <add>, %64, %cst_37 [1] : vector<2x8x32xf32> to vector<2x32xf32>
    %66 = vector.broadcast %61 : vector<2x1xf32> to vector<2x32xf32>
    %67 = arith.mulf %66, %8 : vector<2x32xf32>
    %68 = arith.addf %65, %67 : vector<2x32xf32>
    %69 = arith.addf %68, %15 : vector<2x32xf32>
    %c0_38 = arith.constant 0 : index
    %c0_39 = arith.constant 0 : index
    %70 = vector.load %arg15[%c0_38, %c0_39] : memref<32x32xf32, #tpu.memory_space<vmem>>, vector<32x32xf32>
    %cst_40 = arith.constant dense<0.000000e+00> : vector<2x32xf32>
    %71 = tpu.matmul %69, %70, %cst_40 {dimension_numbers = #tpu.dot_dimension_numbers<[1], [0], [0], [1], [0, 0, 1, 1], [], []>} : vector<2x32xf32>, vector<32x32xf32>, vector<2x32xf32> -> vector<2x32xf32>
    %c0_41 = arith.constant 0 : index
    %c0_42 = arith.constant 0 : index
    %72 = vector.load %arg16[%c0_41, %c0_42] : memref<1x32xf32, #tpu.memory_space<vmem>>, vector<1x32xf32>
    %73 = vector.broadcast %72 : vector<1x32xf32> to vector<2x32xf32>
    %74 = arith.addf %71, %73 : vector<2x32xf32>
    %75 = math.tanh %74 : vector<2x32xf32>
    %c0_43 = arith.constant 0 : index
    %c0_44 = arith.constant 0 : index
    %76 = vector.load %arg17[%c0_43, %c0_44] : memref<2x32xf32, #tpu.memory_space<vmem>>, vector<2x32xf32>
    tpu.vector_store %arg17[%c0_43, %c0_44], %75 {strides = array<i32>} : memref<2x32xf32, #tpu.memory_space<vmem>>, vector<2x32xf32>,
    %c0_45 = arith.constant 0 : index
    %c0_46 = arith.constant 0 : index
    %77 = vector.load %arg18[%c0_45, %c0_46] : memref<2x8xf32, #tpu.memory_space<vmem>>, vector<2x8xf32>
    tpu.vector_store %arg18[%c0_45, %c0_46], %60 {strides = array<i32>} : memref<2x8xf32, #tpu.memory_space<vmem>>, vector<2x8xf32>,
    return
  }
  func.func @transform_0(%arg0: i32) -> (i32, i32, i32) {
    %c0_i32 = arith.constant 0 : i32
    %c0_i32_0 = arith.constant 0 : i32
    %c0_i32_1 = arith.constant 0 : i32
    return %arg0, %c0_i32, %c0_i32_0 : i32, i32, i32
  }
  func.func @transform_1(%arg0: i32) -> (i32, i32) {
    %c0_i32 = arith.constant 0 : i32
    %c0_i32_0 = arith.constant 0 : i32
    return %arg0, %c0_i32 : i32, i32
  }
  func.func @transform_2(%arg0: i32) -> (i32, i32) {
    %c0_i32 = arith.constant 0 : i32
    %c0_i32_0 = arith.constant 0 : i32
    return %arg0, %c0_i32 : i32, i32
  }
  func.func @transform_3(%arg0: i32) -> (i32, i32) {
    %c0_i32 = arith.constant 0 : i32
    %c0_i32_0 = arith.constant 0 : i32
    %c0_i32_1 = arith.constant 0 : i32
    return %c0_i32, %c0_i32_0 : i32, i32
  }
  func.func @transform_4(%arg0: i32) -> (i32, i32) {
    %c0_i32 = arith.constant 0 : i32
    %c0_i32_0 = arith.constant 0 : i32
    %c0_i32_1 = arith.constant 0 : i32
    return %c0_i32, %c0_i32_0 : i32, i32
  }
  func.func @transform_5(%arg0: i32) -> (i32, i32) {
    %c0_i32 = arith.constant 0 : i32
    %c0_i32_0 = arith.constant 0 : i32
    %c0_i32_1 = arith.constant 0 : i32
    return %c0_i32, %c0_i32_0 : i32, i32
  }
  func.func @transform_6(%arg0: i32) -> (i32, i32) {
    %c0_i32 = arith.constant 0 : i32
    %c0_i32_0 = arith.constant 0 : i32
    %c0_i32_1 = arith.constant 0 : i32
    return %c0_i32, %c0_i32_0 : i32, i32
  }
  func.func @transform_7(%arg0: i32) -> (i32, i32) {
    %c0_i32 = arith.constant 0 : i32
    %c0_i32_0 = arith.constant 0 : i32
    %c0_i32_1 = arith.constant 0 : i32
    return %c0_i32, %c0_i32_0 : i32, i32
  }
  func.func @transform_8(%arg0: i32) -> (i32, i32) {
    %c0_i32 = arith.constant 0 : i32
    %c0_i32_0 = arith.constant 0 : i32
    %c0_i32_1 = arith.constant 0 : i32
    return %c0_i32, %c0_i32_0 : i32, i32
  }
  func.func @transform_9(%arg0: i32) -> (i32, i32) {
    %c0_i32 = arith.constant 0 : i32
    %c0_i32_0 = arith.constant 0 : i32
    %c0_i32_1 = arith.constant 0 : i32
    return %c0_i32, %c0_i32_0 : i32, i32
  }
  func.func @transform_10(%arg0: i32) -> (i32, i32) {
    %c0_i32 = arith.constant 0 : i32
    %c0_i32_0 = arith.constant 0 : i32
    %c0_i32_1 = arith.constant 0 : i32
    return %c0_i32, %c0_i32_0 : i32, i32
  }
  func.func @transform_11(%arg0: i32) -> (i32, i32) {
    %c0_i32 = arith.constant 0 : i32
    %c0_i32_0 = arith.constant 0 : i32
    %c0_i32_1 = arith.constant 0 : i32
    return %c0_i32, %c0_i32_0 : i32, i32
  }
  func.func @transform_12(%arg0: i32) -> (i32, i32) {
    %c0_i32 = arith.constant 0 : i32
    %c0_i32_0 = arith.constant 0 : i32
    %c0_i32_1 = arith.constant 0 : i32
    return %c0_i32, %c0_i32_0 : i32, i32
  }
  func.func @transform_13(%arg0: i32) -> (i32, i32) {
    %c0_i32 = arith.constant 0 : i32
    %c0_i32_0 = arith.constant 0 : i32
    %c0_i32_1 = arith.constant 0 : i32
    return %c0_i32, %c0_i32_0 : i32, i32
  }
  func.func @transform_14(%arg0: i32) -> (i32, i32) {
    %c0_i32 = arith.constant 0 : i32
    %c0_i32_0 = arith.constant 0 : i32
    %c0_i32_1 = arith.constant 0 : i32
    return %c0_i32, %c0_i32_0 : i32, i32
  }
  func.func @transform_15(%arg0: i32) -> (i32, i32) {
    %c0_i32 = arith.constant 0 : i32
    %c0_i32_0 = arith.constant 0 : i32
    %c0_i32_1 = arith.constant 0 : i32
    return %c0_i32, %c0_i32_0 : i32, i32
  }
  func.func @transform_16(%arg0: i32) -> (i32, i32) {
    %c0_i32 = arith.constant 0 : i32
    %c0_i32_0 = arith.constant 0 : i32
    return %arg0, %c0_i32 : i32, i32
  }
  func.func @transform_17(%arg0: i32) -> (i32, i32) {
    %c0_i32 = arith.constant 0 : i32
    %c0_i32_0 = arith.constant 0 : i32
    return %arg0, %c0_i32 : i32, i32
  }
}

</mosaic_0001>

<bundles_post_ra>
// kernel: tpu_custom_call.1
= control target key start
LH: loop header
LB: loop body
LE: loop exit
PB: predicated region body
PF: predicated region fallthrough
CT: control target
= control target key end

     0   :  { %s1780_s0 = inlined_call_operand.hbm [shape: f32[2,8,32], index: 0, kind: input, shape index: {}]   ;;  %s1781_s1 = inlined_call_operand.vmem [shape: f32[2,32], index: 1, kind: input, shape index: {}]   ;;  %s1782_s2 = inlined_call_operand.hbm [shape: f32[2,32], index: 2, kind: input, shape index: {}]   ;;  %s1783_s3 = inlined_call_operand.hbm [shape: f32[32,32], index: 3, kind: input, shape index: {}]   ;;  %s1784_s4 = inlined_call_operand.hbm [shape: f32[1,32], index: 4, kind: input, shape index: {}]   ;;  %s1785_s5 = inlined_call_operand.hbm [shape: f32[32,32], index: 5, kind: input, shape index: {}]   ;;  %s1786_s6 = inlined_call_operand.hbm [shape: f32[1,32], index: 6, kind: input, shape index: {}]   ;;  %s1787_s7 = inlined_call_operand.hbm [shape: f32[32,32], index: 7, kind: input, shape index: {}]   ;;  %s1788_s8 = inlined_call_operand.hbm [shape: f32[1,32], index: 8, kind: input, shape index: {}]   ;;  %s1789_s9 = inlined_call_operand.vmem [shape: f32[32,32], index: 9, kind: input, shape index: {}]   ;;  %s1790_s10 = inlined_call_operand.vmem [shape: f32[1,32], index: 10, kind: input, shape index: {}]   ;;  %s1791_s11 = inlined_call_operand.hbm [shape: f32[32,32], index: 11, kind: input, shape index: {}]   ;;  %s1792_s12 = inlined_call_operand.vmem [shape: f32[1,32], index: 12, kind: input, shape index: {}]   ;;  %s1793_s13 = inlined_call_operand.vmem [shape: f32[1,32], index: 13, kind: input, shape index: {}]   ;;  %s1794_s14 = inlined_call_operand.hbm [shape: f32[32,32], index: 14, kind: input, shape index: {}]   ;;  %s1795_s15 = inlined_call_operand.vmem [shape: f32[1,32], index: 15, kind: input, shape index: {}]   ;;  %s1796_s16 = inlined_call_operand.hbm [shape: f32[2,32], index: 16, kind: output, shape index: {0}]   ;;  %s1797_s17 = inlined_call_operand.hbm [shape: f32[2,8], index: 17, kind: output, shape index: {1}]  }
   0x1   :  { %1799 = sst [smem:[#allocation30_spill]] %s1780_s0 }
   0x2   :  { %1800 = sst [smem:[#allocation31_spill]] %s1781_s1 }
   0x3   :  { %23 = vsyncpa [#allocation3], 0 }
   0x4   :  { %24 = vsyncpa [#allocation6], 0 }
   0x5   :  { %25 = vsyncpa [#allocation9], 0 }
   0x6   :  { %26 = vsyncpa [#allocation12], 0 }
   0x7   :  { %27 = vsyncpa [#allocation15], 0 }
   0x8   :  { %28 = vsyncpa [#allocation18], 0 }
   0x9   :  { %29 = vsyncpa [#allocation4], 0 }
   0xa   :  { %30 = vsyncpa [#allocation21], 0  ;;  %s1402_s24 = smov [#allocation5]   ;;  %s1403_s26 = smov [#allocation8]  }
   0xb   :  { %s51_s25 = sshll.u32 %s1402_s24, 4  ;;  %s73_s27 = sshll.u32 %s1403_s26, 4  ;;  %s52_s25 = int_to_ptr.vmem [resolvable:$true] %s51_s25  ;;  %s74_s27 = int_to_ptr.vmem [resolvable:$true] %s73_s27 }
   0xc   :  { %s1122_s0 = scalar_lea.hbm %s1782_s2, 32 }
   0xd   :  { %p1123_p0 = scmp.ne.s32.totalorder %s1782_s2, %s1122_s0  ;;  %p1126_p1 = scmp.lt.u32.totalorder %s1122_s0, %s1782_s2 }
   0xf   :  { %p1128_p2 = pnand %p1126_p1, %p1123_p0 }
  0x11   :  { %1131 = shalt.err (!%p1128_p2)
}
  0x12   :  { %s1132_s20 = scalar_lea.vmem %s52_s25, 32  ;;  %p1137_p4 = scmp.lt.s32.totalorder %s52_s25, %s52_s25 }
  0x13   :  { %p1133_p3 = scmp.ne.s32.totalorder %s52_s25, %s1132_s20  ;;  %p1138_p5 = scmp.lt.s32.totalorder %s1132_s20, %s1132_s20 }
  0x15   :  { %p1139_p6 = por %p1138_p5, %p1137_p4 }
  0x17   :  { %p1140_p7 = pnand %p1139_p6, %p1133_p3 }
  0x19   :  { %1143 = shalt.err (!%p1140_p7)
}
  0x1a   :  { %54 = dma.hbm_to_vmem [thread:$0]  %s1782_s2, 32, %s52_s25, [#allocation6]  }
  0x1b   :  { %s1144_s26 = scalar_lea.hbm %s1784_s4, 16 }
  0x1c   :  { %p1145_p8 = scmp.ne.s32.totalorder %s1784_s4, %s1144_s26  ;;  %p1148_p9 = scmp.lt.u32.totalorder %s1144_s26, %s1784_s4 }
  0x1e   :  { %p1150_p10 = pnand %p1148_p9, %p1145_p8 }
  0x20   :  { %1153 = shalt.err (!%p1150_p10)
}
  0x21   :  { %s1154_s18 = scalar_lea.vmem %s74_s27, 16  ;;  %s1158_s19 = scalar_lea.vmem %s74_s27, 32 }
  0x22   :  { %p1155_p11 = scmp.ne.s32.totalorder %s74_s27, %s1154_s18  ;;  %p1159_p12 = scmp.lt.s32.totalorder %s74_s27, %s74_s27 }
  0x23   :  { %p1160_p13 = scmp.lt.s32.totalorder %s1158_s19, %s1154_s18 }
  0x25   :  { %p1161_p0 = por %p1160_p13, %p1159_p12 }
  0x27   :  { %p1162_p1 = pnand %p1161_p0, %p1155_p11 }
  0x29   :  { %1165 = shalt.err (!%p1162_p1)
}
  0x2a   :  { %76 = dma.hbm_to_vmem [thread:$0]  %s1784_s4, 16, %s74_s27, [#allocation9]  }
  0x2b   :  { %s1404_s1 = smov [#allocation11]   ;;  %s1405_s21 = smov [#allocation14]  }
  0x2c   :  { %s95_s20 = sshll.u32 %s1404_s1, 4  ;;  %s117_s22 = sshll.u32 %s1405_s21, 4  ;;  %s96_s20 = int_to_ptr.vmem [resolvable:$true] %s95_s20  ;;  %s118_s22 = int_to_ptr.vmem [resolvable:$true] %s117_s22 }
  0x2d   :  { %s1166_s26 = scalar_lea.hbm %s1786_s6, 16 }
  0x2e   :  { %p1167_p2 = scmp.ne.s32.totalorder %s1786_s6, %s1166_s26  ;;  %p1170_p3 = scmp.lt.u32.totalorder %s1166_s26, %s1786_s6 }
  0x30   :  { %p1172_p4 = pnand %p1170_p3, %p1167_p2 }
  0x32   :  { %1175 = shalt.err (!%p1172_p4)
}
  0x33   :  { %s1176_s4 = scalar_lea.vmem %s96_s20, 16  ;;  %s1180_s27 = scalar_lea.vmem %s96_s20, 32 }
  0x34   :  { %p1177_p5 = scmp.ne.s32.totalorder %s96_s20, %s1176_s4  ;;  %p1181_p6 = scmp.lt.s32.totalorder %s96_s20, %s96_s20 }
  0x35   :  { %p1182_p7 = scmp.lt.s32.totalorder %s1180_s27, %s1176_s4 }
  0x37   :  { %p1183_p8 = por %p1182_p7, %p1181_p6 }
  0x39   :  { %p1184_p9 = pnand %p1183_p8, %p1177_p5 }
  0x3b   :  { %1187 = shalt.err (!%p1184_p9)
}
  0x3c   :  { %98 = dma.hbm_to_vmem [thread:$0]  %s1786_s6, 16, %s96_s20, [#allocation12]  }
  0x3d   :  { %s1188_s1 = scalar_lea.hbm %s1788_s8, 16 }
  0x3e   :  { %p1189_p10 = scmp.ne.s32.totalorder %s1788_s8, %s1188_s1  ;;  %p1192_p11 = scmp.lt.u32.totalorder %s1188_s1, %s1788_s8 }
  0x40   :  { %p1194_p12 = pnand %p1192_p11, %p1189_p10 }
  0x42   :  { %1197 = shalt.err (!%p1194_p12)
}
  0x43   :  { %s1198_s28 = scalar_lea.vmem %s118_s22, 16  ;;  %s1202_s29 = scalar_lea.vmem %s118_s22, 32 }
  0x44   :  { %p1199_p13 = scmp.ne.s32.totalorder %s118_s22, %s1198_s28  ;;  %p1203_p0 = scmp.lt.s32.totalorder %s118_s22, %s118_s22 }
  0x45   :  { %p1204_p1 = scmp.lt.s32.totalorder %s1202_s29, %s1198_s28 }
  0x47   :  { %p1205_p2 = por %p1204_p1, %p1203_p0 }
  0x49   :  { %p1206_p3 = pnand %p1205_p2, %p1199_p13 }
  0x4b   :  { %1209 = shalt.err (!%p1206_p3)
}
  0x4c   :  { %120 = dma.hbm_to_vmem [thread:$0]  %s1788_s8, 16, %s118_s22, [#allocation15]  }
  0x4d   :  { %s1406_s0 = smov [#allocation2]   ;;  %s1801_s18 = sld [smem:[#allocation30_spill]] }
  0x4e   :  { %s36_s30 = sshll.u32 %s1406_s0, 4  ;;  %s37_s30 = int_to_ptr.vmem [resolvable:$true] %s36_s30 }
  0x53   :  { %s1210_s19 = scalar_lea.hbm %s1801_s18, 256 }
  0x54   :  { %p1211_p4 = scmp.ne.s32.totalorder %s1801_s18, %s1210_s19  ;;  %p1214_p5 = scmp.lt.u32.totalorder %s1210_s19, %s1801_s18 }
  0x56   :  { %p1216_p6 = pnand %p1214_p5, %p1211_p4 }
  0x58   :  { %1219 = shalt.err (!%p1216_p6)
}
  0x59   :  { %s1220_s23 = scalar_lea.vmem %s37_s30, 256  ;;  %p1225_p8 = scmp.lt.s32.totalorder %s37_s30, %s37_s30 }
  0x5a   :  { %p1221_p7 = scmp.ne.s32.totalorder %s37_s30, %s1220_s23  ;;  %p1226_p9 = scmp.lt.s32.totalorder %s1220_s23, %s1220_s23 }
  0x5c   :  { %p1227_p10 = por %p1226_p9, %p1225_p8 }
  0x5e   :  { %p1228_p11 = pnand %p1227_p10, %p1221_p7 }
  0x60   :  { %1231 = shalt.err (!%p1228_p11)
}
  0x61   :  { %s1407_s8 = smov 128   ;;  %s1408_s22 = smov 8  }
  0x62   :  { %42 = dma.hbm_to_vmem [thread:$0]  %s1801_s18, 256, %s37_s30, [#allocation3], %s1407_s8, %s1407_s8, %s1408_s22  }
  0x63   :  { %s1409_s28 = smov [#allocation7]   ;;  %s1410_s6 = smov [#allocation10]  }
  0x64   :  { %s60_s29 = sshll.u32 %s1409_s28, 4  ;;  %s82_s20 = sshll.u32 %s1410_s6, 4  ;;  %s61_s29 = int_to_ptr.vmem [resolvable:$true] %s60_s29  ;;  %s83_s20 = int_to_ptr.vmem [resolvable:$true] %s82_s20 }
  0x65   :  { %s1232_s27 = scalar_lea.hbm %s1783_s3, 512 }
  0x66   :  { %p1233_p12 = scmp.ne.s32.totalorder %s1783_s3, %s1232_s27  ;;  %p1236_p13 = scmp.lt.u32.totalorder %s1232_s27, %s1783_s3 }
  0x68   :  { %p1238_p0 = pnand %p1236_p13, %p1233_p12 }
  0x6a   :  { %1241 = shalt.err (!%p1238_p0)
}
  0x6b   :  { %s1242_s30 = scalar_lea.vmem %s61_s29, 512  ;;  %p1247_p2 = scmp.lt.s32.totalorder %s61_s29, %s61_s29 }
  0x6c   :  { %p1243_p1 = scmp.ne.s32.totalorder %s61_s29, %s1242_s30  ;;  %p1248_p3 = scmp.lt.s32.totalorder %s1242_s30, %s1242_s30 }
  0x6e   :  { %p1249_p4 = por %p1248_p3, %p1247_p2 }
  0x70   :  { %p1250_p5 = pnand %p1249_p4, %p1243_p1 }
  0x72   :  { %1253 = shalt.err (!%p1250_p5)
}
  0x73   :  { %66 = dma.hbm_to_vmem [thread:$0]  %s1783_s3, 512, %s61_s29, [#allocation6], %s1407_s8, %s1407_s8, %s1408_s22  }
  0x74   :  { %s1254_s26 = scalar_lea.hbm %s1785_s5, 512 }
  0x75   :  { %p1255_p6 = scmp.ne.s32.totalorder %s1785_s5, %s1254_s26  ;;  %p1258_p7 = scmp.lt.u32.totalorder %s1254_s26, %s1785_s5 }
  0x77   :  { %p1260_p8 = pnand %p1258_p7, %p1255_p6 }
  0x79   :  { %1263 = shalt.err (!%p1260_p8)
}
  0x7a   :  { %s1264_s27 = scalar_lea.vmem %s83_s20, 512  ;;  %p1269_p10 = scmp.lt.s32.totalorder %s83_s20, %s83_s20 }
  0x7b   :  { %p1265_p9 = scmp.ne.s32.totalorder %s83_s20, %s1264_s27  ;;  %p1270_p11 = scmp.lt.s32.totalorder %s1264_s27, %s1264_s27 }
  0x7d   :  { %p1271_p12 = por %p1270_p11, %p1269_p10 }
  0x7f   :  { %p1272_p13 = pnand %p1271_p12, %p1265_p9 }
  0x81   :  { %1275 = shalt.err (!%p1272_p13)
}
  0x82   :  { %88 = dma.hbm_to_vmem [thread:$0]  %s1785_s5, 512, %s83_s20, [#allocation9], %s1407_s8, %s1407_s8, %s1408_s22  }
  0x83   :  { %s1411_s19 = smov [#allocation13]   ;;  %s1412_s25 = smov [#allocation16]  }
  0x84   :  { %s104_s2 = sshll.u32 %s1411_s19, 4  ;;  %s130_s1 = sshll.u32 %s1412_s25, 4  ;;  %s105_s2 = int_to_ptr.vmem [resolvable:$true] %s104_s2  ;;  %s131_s1 = int_to_ptr.vmem [resolvable:$true] %s130_s1 }
  0x85   :  { %s1276_s21 = scalar_lea.hbm %s1787_s7, 512 }
  0x86   :  { %p1277_p0 = scmp.ne.s32.totalorder %s1787_s7, %s1276_s21  ;;  %p1280_p1 = scmp.lt.u32.totalorder %s1276_s21, %s1787_s7 }
  0x88   :  { %p1282_p2 = pnand %p1280_p1, %p1277_p0 }
  0x8a   :  { %1285 = shalt.err (!%p1282_p2)
}
  0x8b   :  { %s1286_s5 = scalar_lea.vmem %s105_s2, 512  ;;  %p1291_p4 = scmp.lt.s32.totalorder %s105_s2, %s105_s2 }
  0x8c   :  { %p1287_p3 = scmp.ne.s32.totalorder %s105_s2, %s1286_s5  ;;  %p1292_p5 = scmp.lt.s32.totalorder %s1286_s5, %s1286_s5 }
  0x8e   :  { %p1293_p6 = por %p1292_p5, %p1291_p4 }
  0x90   :  { %p1294_p7 = pnand %p1293_p6, %p1287_p3 }
  0x92   :  { %1297 = shalt.err (!%p1294_p7)
}
  0x93   :  { %110 = dma.hbm_to_vmem [thread:$0]  %s1787_s7, 512, %s105_s2, [#allocation12], %s1407_s8, %s1407_s8, %s1408_s22  }
  0x94   :  { %s1298_s27 = scalar_lea.hbm %s1791_s11, 512 }
  0x95   :  { %p1299_p8 = scmp.ne.s32.totalorder %s1791_s11, %s1298_s27  ;;  %p1302_p9 = scmp.lt.u32.totalorder %s1298_s27, %s1791_s11 }
  0x97   :  { %p1304_p10 = pnand %p1302_p9, %p1299_p8 }
  0x99   :  { %1307 = shalt.err (!%p1304_p10)
}
  0x9a   :  { %s1308_s30 = scalar_lea.vmem %s131_s1, 512  ;;  %p1313_p12 = scmp.lt.s32.totalorder %s131_s1, %s131_s1 }
  0x9b   :  { %p1309_p11 = scmp.ne.s32.totalorder %s131_s1, %s1308_s30  ;;  %p1314_p13 = scmp.lt.s32.totalorder %s1308_s30, %s1308_s30 }
  0x9d   :  { %p1315_p0 = por %p1314_p13, %p1313_p12 }
  0x9f   :  { %p1316_p1 = pnand %p1315_p0, %p1309_p11 }
  0xa1   :  { %1319 = shalt.err (!%p1316_p1)
}
  0xa2   :  { %136 = dma.hbm_to_vmem [thread:$0]  %s1791_s11, 512, %s131_s1, [#allocation15], %s1407_s8, %s1407_s8, %s1408_s22  }
  0xa3   :  { %s1413_s18 = smov [#allocation17]   ;;  %s1320_s26 = scalar_lea.hbm %s1794_s14, 512 }
  0xa4   :  { %s146_s21 = sshll.u32 %s1413_s18, 4  ;;  %p1321_p2 = scmp.ne.s32.totalorder %s1794_s14, %s1320_s26  ;;  %s147_s21 = int_to_ptr.vmem [resolvable:$true] %s146_s21 }
  0xa5   :  { %p1324_p3 = scmp.lt.u32.totalorder %s1320_s26, %s1794_s14 }
  0xa7   :  { %p1326_p4 = pnand %p1324_p3, %p1321_p2 }
  0xa9   :  { %1329 = shalt.err (!%p1326_p4)
}
  0xaa   :  { %s1330_s0 = scalar_lea.vmem %s147_s21, 512  ;;  %p1335_p6 = scmp.lt.s32.totalorder %s147_s21, %s147_s21 }
  0xab   :  { %p1331_p5 = scmp.ne.s32.totalorder %s147_s21, %s1330_s0  ;;  %p1336_p7 = scmp.lt.s32.totalorder %s1330_s0, %s1330_s0 }
  0xad   :  { %p1337_p8 = por %p1336_p7, %p1335_p6 }
  0xaf   :  { %p1338_p9 = pnand %p1337_p8, %p1331_p5 }
  0xb1   :  { %1341 = shalt.err (!%p1338_p9)
}
  0xb2   :  { %152 = dma.hbm_to_vmem [thread:$0]  %s1794_s14, 512, %s147_s21, [#allocation18], %s1407_s8, %s1407_s8, %s1408_s22  }
  0xb3   :  { %1386 = dma.done.wait [#allocation3], 256  }
  0xb4   :  { %1387 = vsyncadd [#allocation3], 4294967040 }
  0xb5   :  { %1388 = dma.done.wait [#allocation6], 544  }
  0xb6   :  { %1389 = vsyncadd [#allocation6], 4294966752 }
  0xb7   :  { %1390 = dma.done.wait [#allocation9], 528  }
  0xb8   :  { %1391 = vsyncadd [#allocation9], 4294966768 }
  0xb9   :  { %1392 = dma.done.wait [#allocation12], 528  }
  0xba   :  { %1393 = vsyncadd [#allocation12], 4294966768 }
  0xbb   :  { %1394 = dma.done.wait [#allocation15], 528  }
  0xbc   :  { %1395 = vsyncadd [#allocation15], 4294966768 }
  0xbd   :  { %1396 = dma.done.wait [#allocation18], 512  }
  0xbe   :  { %1397 = vsyncadd [#allocation18], 4294966784  ;;  %v1414_v0 = vmov 0.0|0.0   ;;  %vm1415_vm0 = vmmov 0   ;;  %v1416_v1 = vmov 0.0   ;;  %v275_v2 = vld [vmem:[#allocation10] sm:$0xff]  ;;  %v624_v48 = vlaneseq }
  0xbf   :  { %1047 = vmatprep.subr.bf16.mxu1 %v1414_v0  ;;  %994 = vmatprep.mubr.msk.f32.mxu1 %vm1415_vm0, %v1416_v1  ;;  %v276_v3 = vld [vmem:[#allocation10 + $0x8] sm:$0xff]  ;;  %v277_v4 = vld [vmem:[#allocation10 + $0x10] sm:$0xff]  ;;  %v278_v6 = vld [vmem:[#allocation10 + $0x18] sm:$0xff]  ;;  %vm199_vm1 = vcmask 261120   ;;  %s1802_s22 = sld [smem:[#allocation31_spill]]  ;;  %vm675_vm2 = vcmask 254976  }
  0xc0   :  { %1041 = vmatprep.subr.bf16.mxu0 %v1414_v0  ;;  %983 = vmatprep.mubr.msk.f32.mxu0 %vm1415_vm0, %v1416_v1  ;;  %v1048_v5 = vpack.c.bf16 %v276_v3, %v275_v2  ;;  %v188_v7 = vld [vmem:[#allocation7] sm:$0xff]  ;;  %v189_v8 = vld [vmem:[#allocation7 + $0x8] sm:$0xff]  ;;  %v190_v9 = vld [vmem:[#allocation7 + $0x10] sm:$0xff]  ;;  %v1051_v11 = vpack.c.bf16 %v278_v6, %v277_v4  ;;  %v1417_v46 = vmov 1966171168   ;;  %v1703_v52 = vshrl.u32 %v624_v48, 7 }
  0xc1   :  { %v191_v10 = vld [vmem:[#allocation7 + $0x18] sm:$0xff]  ;;  %v1042_v12 = vpack.c.bf16 %v189_v8, %v188_v7  ;;  %v360_v16 = vld [vmem:[%s1789_s9] sm:$0xff]  ;;  %v444_v18 = vld [vmem:[#allocation13] sm:$0xff]  ;;  %v622_v47 = vunpack.c.l.s4 %v1417_v46  ;;  %vm691_vm3 = vcmask 1041409   ;;  %vm694_vm4 = vcmask 58368  }
  0xc2   :  { %1049 = vmatpush3.bf16.msra.mxu1 %v1048_v5  ;;  %v1045_v13 = vpack.c.bf16 %v191_v10, %v190_v9  ;;  %v187_v15 = vld [vmem:[#allocation5] sm:$0x3]  ;;  %v361_v17 = vld [vmem:[%s1789_s9 + $0x8] sm:$0xff]  ;;  %v445_v20 = vld [vmem:[#allocation13 + $0x8] sm:$0xff]  ;;  %v1713_v2 = vsub.s32 0, %v1703_v52 }
  0xc3   :  { %1050 = vmatprep.subr.bf16.mxu1 %v1414_v0  ;;  %1043 = vmatpush3.bf16.msra.mxu0 %v1042_v12  ;;  %v1054_v19 = vpack.c.bf16 %v361_v17, %v360_v16  ;;  %v1060_v21 = vpack.c.bf16 %v445_v20, %v444_v18  ;;  %v362_v22 = vld [vmem:[%s1789_s9 + $0x10] sm:$0xff]  ;;  %v363_v23 = vld [vmem:[%s1789_s9 + $0x18] sm:$0xff]  ;;  %v446_v24 = vld [vmem:[#allocation13 + $0x10] sm:$0xff]  ;;  %v623_v51 = vunpack.c.0.s8 %v622_v47 }
  0xc4   :  { %1044 = vmatprep.subr.bf16.mxu0 %v1414_v0  ;;  %v1057_v25 = vpack.c.bf16 %v363_v23, %v362_v22  ;;  %v447_v26 = vld [vmem:[#allocation13 + $0x18] sm:$0xff]  ;;  %v528_v27 = vld [vmem:[#allocation16] sm:$0xff]  ;;  %v529_v28 = vld [vmem:[#allocation16 + $0x8] sm:$0xff]  ;;  %v682_v22 = vand.u32 127, %v624_v48 }
  0xc5   :  { %v274_v14 = vld [vmem:[%s1802_s22] sm:$0x3]  ;;  %v1063_v29 = vpack.c.bf16 %v447_v26, %v446_v24  ;;  %v1065_v30 = vpack.c.bf16 %v529_v28, %v528_v27  ;;  %v932_v31 = vld [vmem:[#allocation11] ss:$0 sm:$0xff]  ;;  %v930_v33 = vld [vmem:[#allocation8] ss:$0 sm:$0xff]  ;;  %v626_v55 = vsub.s32 %v623_v51, %v1703_v52 }
  0xc6   :  { %1052 = vmatpush3.bf16.msra.mxu1 %v1051_v11  ;;  %v530_v40 = vld [vmem:[#allocation16 + $0x10] sm:$0xff]  ;;  %v531_v41 = vld [vmem:[#allocation16 + $0x18] sm:$0xff]  ;;  %v1691_v43 = vld [vmem:[#allocation2] sm:$0xff]  ;;  %v1724_v24 = vsub.s32 %v682_v22, %v1703_v52 }
  0xc7   :  { %1059 = vmatprep.subr.bf16.mxu1 %v1414_v0  ;;  %1046 = vmatpush3.bf16.msra.mxu0 %v1045_v13  ;;  %v1069_v42 = vpack.c.bf16 %v531_v41, %v530_v40  ;;  %v1699_v45 = vld [vmem:[#allocation2 + $0x8] sm:$0xff]  ;;  %v936_v53 = vld [vmem:[#allocation14] ss:$0 sm:$0xff]  ;;  %v934_v54 = vld [vmem:[%s1790_s10] ss:$0 sm:$0xff] }
  0xc8   :  { %1053 = vmatprep.subr.bf16.mxu0 %v1414_v0  ;;  %v941_v12 = vld [vmem:[%s1793_s13] ss:$0 sm:$0xff] }
  0xc9   :  { %995 = vmatmul.mubr.msk.f32.vlgmr.msra.gmra.mrb[0].mxu1 %vm199_vm1, %v274_v14 }
  0xca   :  { %1016 = vmatprep.mubr.msk.f32.mxu1 %vm1415_vm0, %v1416_v1  ;;  %984 = vmatmul.mubr.msk.f32.vlgmr.msra.gmra.mrb[0].mxu0 %vm199_vm1, %v187_v15 }
  0xcb   :  { %1005 = vmatprep.mubr.msk.f32.mxu0 %vm1415_vm0, %v1416_v1  ;;  %1055 = vmatpush3.bf16.msra.mxu0 %v1054_v19 }
  0xcc   :  { %1061 = vmatpush3.bf16.msra.mxu1 %v1060_v21  ;;  %1056 = vmatprep.subr.bf16.mxu0 %v1414_v0 }
  0xcd   :  { %1062 = vmatprep.subr.bf16.mxu1 %v1414_v0 }
  0xcf   :  { %1058 = vmatpush3.bf16.msra.mxu0 %v1057_v25 }
  0xd0   :  { %1064 = vmatpush3.bf16.msra.mxu1 %v1063_v29  ;;  %1066 = vmatprep.subr.bf16.mxu0 %v1065_v30 }
  0xd1   :  { %1073 = vmatprep.subr.bf16.mxu1 %v1414_v0 }
 0x19c   :  { %v355_v32 = vpop.f32.mrb[0].mxu1 }
 0x19d   :  { %v356_v34 = vadd.f32 %v932_v31, %v355_v32  ;;  %v996_v35 = vpop.f32.mrb[1].mxu1  ;;  %v269_v36 = vpop.f32.mrb[0].mxu0  ;;  %v706_v32 = vsub.s32 1, %v1703_v52 }
 0x19e   :  { %v1683_v37 = vadd.f32 %v930_v33, %v269_v36  ;;  %v985_v38 = vpop.f32.mrb[1].mxu0 }
 0x19f   :  { %1100 = vtanh.f32 %v356_v34 }
 0x1a0   :  { %v273_v39 = vmax.f32 %v1683_v37, 0.0 }
 0x1a2   :  { %1017 = vmatmul.mubr.msk.f32.vlgmr.msra.gmra.mrb[2].mxu1 %vm199_vm1, %v273_v39 }
 0x1a3   :  { %1038 = vmatprep.mubr.msk.f32.mxu1 %vm1415_vm0, %v1416_v1  ;;  %v938_v1 = vld [vmem:[%s1792_s12] ss:$0 sm:$0xff]  ;;  %s1419_s12 = smov [#allocation20]  }
 0x1a4   :  { %s912_s13 = sshll.u32 %s1419_s12, 4  ;;  %s913_s13 = int_to_ptr.vmem [resolvable:$true] %s912_s13 }
 0x1a5   :  { %s1342_s24 = scalar_lea.vmem %s913_s13, 32  ;;  %p1347_p11 = scmp.lt.s32.totalorder %s913_s13, %s913_s13 }
 0x1a6   :  { %p1343_p10 = scmp.ne.s32.totalorder %s913_s13, %s1342_s24  ;;  %p1348_p12 = scmp.lt.s32.totalorder %s1342_s24, %s1342_s24 }
 0x1a8   :  { %p1349_p13 = por %p1348_p12, %p1347_p11 }
 0x1a9   :  { %v1693_v44 = vpop.eup %1100 }
 0x1aa   :  { %1006 = vmatmul.mubr.msk.f32.vlgmr.msra.gmra.mrb[2].mxu0 %vm199_vm1, %v1693_v44  ;;  %p1350_p0 = pnand %p1349_p13, %p1343_p10 }
 0x1ab   :  { %1068 = vmatpush3.bf16.msra.mxu0 %v1065_v30  ;;  %1027 = vmatprep.mubr.msk.f32.mxu0 %vm199_vm1, %v1691_v43  ;;  %v1418_v30 = vmov 0  }
 0x1ac   :  { %1070 = vmatprep.subr.bf16.mxu0 %v1069_v42  ;;  %1099 = vset.pattern.permute.xlu1 %v1418_v30 }
 0x1ad   :  { %1098 = vset.pattern.permute.xlu0 %v1418_v30  ;;  %v791_v30 = vrot.slane %v1693_v44, 1 }
 0x1af   :  { %1072 = vmatpush3.bf16.msra.mxu0 %v1069_v42 }
 0x1b2   :  { %1028 = vmatmul.mubr.msk.f32.vlgmr.msra.gmra.mrb[4].mxu0 %vm199_vm1, %v1699_v45 }
 0x275   :  { %v524_v49 = vpop.f32.mrb[2].mxu1 }
 0x276   :  { %v1018_v50 = vpop.f32.mrb[3].mxu1  ;;  %v525_v56 = vadd.f32 %v936_v53, %v524_v49 }
 0x27d   :  { %v440_v57 = vpop.f32.mrb[2].mxu0 }
 0x27e   :  { %v441_v58 = vadd.f32 %v934_v54, %v440_v57  ;;  %v1007_v59 = vpop.f32.mrb[3].mxu0 }
 0x280   :  { %v627_v60 = vrot.slane %v441_v58, %v626_v55  ;;  %v657_v61 = vadd.f32 %v525_v56, %v441_v58 }
 0x282   :  { %v628_v62 = vcombine.high %v627_v60, %v627_v60  ;;  %1102 = vtanh.f32 %v657_v61  ;;  %v635_v63 = vrot.slane %v627_v60, %v626_v55 }
 0x284   :  { %v642_v3 = vrot.slane %v628_v62, %v626_v55  ;;  %v646_v9 = vrot.slane %v635_v63, %v1713_v2 }
 0x285   :  { %v1029_v4 = vpop.f32.mrb[4].mxu0 }
 0x286   :  { %v617_v5 = vadd.f32 %v1029_v4, %v938_v1  ;;  %v650_v6 = vrot.slane %v642_v3, %v1713_v2  ;;  %v611_v7 = vpop.f32.mrb[5].mxu0 }
 0x287   :  { %v612_v8 = vadd.f32 %v938_v1, %v611_v7 }
 0x288   :  { %v654_v10 = vadd.f32 %v650_v6, %v617_v5  ;;  %v796_v5 = vld [vmem:[#allocation17] sm:$0xff]  ;;  %v797_v6 = vld [vmem:[#allocation17 + $0x8] sm:$0xff] }
 0x289   :  { %v653_v11 = vadd.f32 %v646_v9, %v612_v8  ;;  %v1074_v7 = vpack.c.bf16 %v797_v6, %v796_v5  ;;  %v798_v8 = vld [vmem:[#allocation17 + $0x10] sm:$0xff]  ;;  %v799_v9 = vld [vmem:[#allocation17 + $0x18] sm:$0xff] }
 0x28a   :  { %1104 = vtanh.f32 %v654_v10  ;;  %v1077_v10 = vpack.c.bf16 %v799_v9, %v798_v8 }
 0x28b   :  { %1106 = vtanh.f32 %v653_v11  ;;  %1075 = vmatpush3.bf16.msra.mxu1 %v1074_v7 }
 0x28c   :  { %v1103_v13 = vpop.eup %1102  ;;  %1076 = vmatprep.subr.bf16.mxu1 %v1414_v0 }
 0x28d   :  { %v674_v14 = vmul.f32 %v1103_v13, %v941_v12 }
 0x28f   :  { %v676_v15 = vsel %vm675_vm2, %v674_v14, 0.0  ;;  %1078 = vmatpush3.bf16.msra.mxu1 %v1077_v10 }
 0x290   :  { %677 = vadd.xlane.f32.xlu1 %v676_v15 }
 0x294   :  { %v1105_v16 = vpop.eup %1104 }
 0x295   :  { %v1107_v17 = vpop.eup %1106  ;;  %v667_v20 = vmul.f32 %v1105_v16, %v941_v12 }
 0x296   :  { %v666_v18 = vmul.f32 %v1107_v17, %v941_v12 }
 0x297   :  { %v671_v21 = vsel %vm199_vm1, %v667_v20, 0.0 }
 0x298   :  { %v668_v19 = vsel %vm199_vm1, %v666_v18, 0.0 }
 0x299   :  { %669 = vadd.xlane.f32.xlu0 %v668_v19 }
 0x29d   :  { %672 = vadd.xlane.f32.xlu0 %v671_v21 }
 0x31d   :  { %v678_v31 = vpop.xlane.xlu1 %677 }
 0x326   :  { %v670_v23 = vpop.xlane.xlu0 %669 }
 0x327   :  { %v686_v26 = vrot.slane %v670_v23, %v1724_v24 }
 0x32a   :  { %v673_v25 = vpop.xlane.xlu0 %672 }
 0x32b   :  { %v690_v27 = vrot.slane %v673_v25, %v1724_v24 }
 0x32d   :  { %v692_v28 = vsel %vm691_vm3, %v690_v27, %v686_v26 }
 0x32e   :  { %v695_v29 = vsel %vm694_vm4, %v692_v28, -inf }
 0x32f   :  { %696 = vmax.xlane.f32.xlu1 %v695_v29 }
 0x3bc   :  { %v697_v33 = vpop.xlane.xlu1 %696 }
 0x3bd   :  { %v698_v34 = vmax.f32 %v697_v33, %v678_v31 }
 0x3bf   :  { %v703_v35 = vrot.slane %v698_v34, %v1713_v2  ;;  %v707_v36 = vrot.slane %v698_v34, %v706_v32  ;;  %v716_v38 = vsub.f32 %v678_v31, %v698_v34 }
 0x3c1   :  { %v710_v40 = vsub.f32 %v670_v23, %v703_v35  ;;  %v711_v41 = vsub.f32 %v673_v25, %v707_v36  ;;  %v717_v55 = vmul.f32 1.442695, %v716_v38 }
 0x3c3   :  { %v712_v42 = vmul.f32 1.442695, %v710_v40  ;;  %v714_v46 = vmul.f32 1.442695, %v711_v41 }
 0x3c5   :  { %1108 = vpow2.f32 %v712_v42 }
 0x3c6   :  { %1110 = vpow2.f32 %v714_v46 }
 0x3c7   :  { %1112 = vpow2.f32 %v717_v55 }
 0x3cf   :  { %v1109_v47 = vpop.eup %1108 }
 0x3d0   :  { %v1111_v48 = vpop.eup %1110  ;;  %722 = vperm.xlu0 %1098, %v1109_v47  }
 0x3d1   :  { %725 = vperm.xlu1 %1099, %v1111_v48   ;;  %v1113_v56 = vpop.eup %1112 }
 0x44f   :  { %v723_v49 = vpop.permute.xlu0 %722 }
 0x450   :  { %v726_v50 = vpop.permute.xlu1 %725  ;;  %v730_v51 = vrot.slane %v723_v49, %v1724_v24 }
 0x451   :  { %v734_v52 = vrot.slane %v726_v50, %v1724_v24 }
 0x453   :  { %v735_v53 = vsel %vm691_vm3, %v734_v52, %v730_v51 }
 0x454   :  { %v737_v54 = vsel %vm694_vm4, %v735_v53, 0.0 }
 0x455   :  { %738 = vadd.xlane.f32.xlu1 %v737_v54 }
 0x4e2   :  { %v739_v57 = vpop.xlane.xlu1 %738 }
 0x4e3   :  { %v740_v58 = vadd.f32 %v1113_v56, %v739_v57 }
 0x4e5   :  { %v749_v59 = vrot.slane %v740_v58, %v706_v32  ;;  %1114 = vrcp.f32 %v740_v58  ;;  %v745_v60 = vrot.slane %v740_v58, %v1713_v2 }
 0x4e7   :  { %1116 = vrcp.f32 %v749_v59 }
 0x4e8   :  { %1118 = vrcp.f32 %v745_v60 }
 0x4ef   :  { %v1115_v61 = vpop.eup %1114 }
 0x4f0   :  { %v757_v62 = vmul.f32 %v1115_v61, %v1113_v56 }
 0x4f1   :  { %v1117_v63 = vpop.eup %1116 }
 0x4f2   :  { %v755_v1 = vmul.f32 %v1117_v63, %v1111_v48  ;;  %v1119_v3 = vpop.eup %1118 }
 0x4f3   :  { %v753_v4 = vmul.f32 %v1119_v3, %v1109_v47 }
 0x4f4   :  { %765 = vperm.xlu0 %1098, %v755_v1  }
 0x4f8   :  { %760 = vperm.xlu0 %1098, %v753_v4  }
 0x573   :  { %v766_v2 = vpop.permute.xlu0 %765 }
 0x574   :  { %v769_v11 = vmul.f32 %v766_v2, %v1699_v45  ;;  %v892_v15 = vrot.slane %v766_v2, %v1724_v24  ;;  %v784_v45 = vmul.f32 %v757_v62, %v273_v39 }
 0x576   :  { %v777_v12 = vsel %vm199_vm1, %v769_v11, 0.0  ;;  %v786_v27 = vrot.slane %v784_v45, 1 }
 0x577   :  { %v778_v13 = vrot.slane %v777_v12, 4  ;;  %v761_v14 = vpop.permute.xlu0 %760 }
 0x578   :  { %v768_v16 = vmul.f32 %v761_v14, %v1691_v43  ;;  %v888_v17 = vrot.slane %v761_v14, %v1724_v24 }
 0x579   :  { %v779_v18 = vadd.f32 %v778_v13, %v777_v12 }
 0x57a   :  { %v770_v0 = vsel %vm199_vm1, %v768_v16, 0.0  ;;  %v893_v19 = vsel %vm691_vm3, %v892_v15, %v888_v17 }
 0x57b   :  { %v780_v20 = vrot.slane %v779_v18, 2  ;;  %v771_v21 = vrot.slane %v770_v0, 4  ;;  %895 = vst.msk [vmem:[#allocation20] sm:$0x3] %vm694_vm4, %v893_v19 }
 0x57d   :  { %v781_v22 = vadd.f32 %v780_v20, %v779_v18  ;;  %v772_v23 = vadd.f32 %v771_v21, %v770_v0 }
 0x57f   :  { %v782_v25 = vrot.slane %v781_v22, 1  ;;  %v773_v26 = vrot.slane %v772_v23, 2 }
 0x581   :  { %v783_v43 = vadd.f32 %v782_v25, %v781_v22  ;;  %v774_v28 = vadd.f32 %v773_v26, %v772_v23 }
 0x583   :  { %v790_v24 = vadd.f32 %v786_v27, %v783_v43  ;;  %v775_v29 = vrot.slane %v774_v28, 1 }
 0x585   :  { %v776_v31 = vadd.f32 %v775_v29, %v774_v28  ;;  %v795_v32 = vadd.f32 %v791_v30, %v790_v24 }
 0x587   :  { %v789_v33 = vadd.f32 %v784_v45, %v776_v31  ;;  %v809_v35 = vrot.slane %v795_v32, 7 }
 0x589   :  { %v794_v34 = vadd.f32 %v1693_v44, %v789_v33 }
 0x58b   :  { %v810_v37 = vsel %vm691_vm3, %v809_v35, %v794_v34 }
 0x58c   :  { %1039 = vmatmul.mubr.msk.f32.vlgmr.msra.gmra.mrb[4].mxu1 %vm199_vm1, %v810_v37 }
 0x58d   :  { %1353 = shalt.err (!%p1350_p0)
}
 0x58e   :  { %s1354_s5 = scalar_lea.hbm %s1797_s17, 32 }
 0x58f   :  { %p1355_p1 = scmp.ne.s32.totalorder %s1797_s17, %s1354_s5  ;;  %p1358_p2 = scmp.lt.u32.totalorder %s1354_s5, %s1797_s17 }
 0x591   :  { %p1360_p3 = pnand %p1358_p2, %p1355_p1 }
 0x593   :  { %1363 = shalt.err (!%p1360_p3)
}
 0x594   :  { %915 = dma.vmem_to_hbm [thread:$0]  %s913_s13, 32, %s1797_s17, [#allocation21]   ;;  %v942_v39 = vld [vmem:[%s1795_s15] ss:$0 sm:$0xff] }
 0x595   :  { %s1420_s4 = smov [#allocation19]  }
 0x596   :  { %s902_s27 = sshll.u32 %s1420_s4, 4  ;;  %s903_s27 = int_to_ptr.vmem [resolvable:$true] %s902_s27 }
 0x597   :  { %s1364_s3 = scalar_lea.vmem %s903_s27, 32  ;;  %p1369_p5 = scmp.lt.s32.totalorder %s903_s27, %s903_s27 }
 0x598   :  { %p1365_p4 = scmp.ne.s32.totalorder %s903_s27, %s1364_s3  ;;  %p1370_p6 = scmp.lt.s32.totalorder %s1364_s3, %s1364_s3 }
 0x59a   :  { %p1371_p7 = por %p1370_p6, %p1369_p5 }
 0x59c   :  { %p1372_p8 = pnand %p1371_p7, %p1365_p4 }
 0x65f   :  { %v879_v44 = vpop.f32.mrb[4].mxu1 }
 0x660   :  { %v880_v36 = vadd.f32 %v942_v39, %v879_v44  ;;  %v1040_v38 = vpop.f32.mrb[5].mxu1 }
 0x662   :  { %1120 = vtanh.f32 %v880_v36 }
 0x66c   :  { %v1121_v40 = vpop.eup %1120 }
 0x66d   :  { %884 = vst.msk [vmem:[#allocation19] sm:$0x3] %vm675_vm2, %v1121_v40 }
 0x66e   :  { %1375 = shalt.err (!%p1372_p8)
}
 0x66f   :  { %s1376_s15 = scalar_lea.hbm %s1796_s16, 32 }
 0x670   :  { %p1377_p9 = scmp.ne.s32.totalorder %s1796_s16, %s1376_s15  ;;  %p1380_p10 = scmp.lt.u32.totalorder %s1376_s15, %s1796_s16 }
 0x672   :  { %p1382_p11 = pnand %p1380_p10, %p1377_p9 }
 0x674   :  { %1385 = shalt.err (!%p1382_p11)
}
 0x675   :  { %905 = dma.vmem_to_hbm [thread:$0]  %s903_s27, 32, %s1796_s16, [#allocation4]  }
 0x676   :  { %1398 = dma.done.wait [#allocation4], 32  }
 0x677   :  { %1399 = vsyncadd [#allocation4], 4294967264 }
 0x678   :  { %1400 = dma.done.wait [#allocation21], 32  }
 0x679   :  { %1401 = vsyncadd [#allocation21], 4294967264 }
 0x67a   :  { %922 = vsyncpa [#allocation3], 1 }
 0x67b   :  { %923 = vsyncpa [#allocation6], 1 }
 0x67c   :  { %924 = vsyncpa [#allocation9], 1 }
 0x67d   :  { %925 = vsyncpa [#allocation12], 1 }
 0x67e   :  { %926 = vsyncpa [#allocation15], 1 }
 0x67f   :  { %927 = vsyncpa [#allocation18], 1 }
 0x680   :  { %928 = vsyncpa [#allocation4], 1 }
 0x681   :  { %929 = vsyncpa [#allocation21], 1 }

</bundles_post_ra>
